<compile_context>
chip_gen: v7x
topology: tpu7x:2x2x1
jax: 0.10.0
libtpu: 0.0.40
codegen_flags: <defaults>
</compile_context>

<pallas_src>
import functools

import jax
import jax.numpy as jnp
from jax.experimental import pallas as pl
from jax.experimental.pallas import tpu as pltpu


_LANE = 128       # lane width (last dim)
_SUBLANE = 8      # f32 sublane packing (second-to-last dim) == channel chunk
_NEG_BIG = -1e30  # softmax pad value -> exp underflows to exactly 0


def _round_up(x, m):
    return (x + m - 1) // m * m


def _cam_kernel(scores_ref, act_ref, cam_ref, mn_ref, mx_ref, *, p_valid, chunk):
    """Per-image fused ScoreCAM combine (one grid step == one image).

    scores_ref: (1, Cp, 1)   padded scores, channels on sublanes
    act_ref:    (1, Cp, Pp)  padded activations, Pp = round_up(H*W, 128)
    cam_ref:    (1, 1, Pp)   relu'd, UN-normalized cam (f32)
    mn_ref:     (1, 1, 1)    per-image min over the p_valid real positions
    mx_ref:     (1, 1, 1)    per-image max over the p_valid real positions
    """
    cp = act_ref.shape[1]
    pp = act_ref.shape[2]

    # Softmax over channels (sublane axis). Padded channels hold -1e30, so
    # their weights are exactly 0 and they contribute nothing to the sums.
    s = scores_ref[0].astype(jnp.float32)                   # (Cp, 1)
    s = s - jnp.max(s, axis=0, keepdims=True)
    e = jnp.exp(s)
    w = e / jnp.sum(e, axis=0, keepdims=True)                # (Cp, 1)

    # Weighted channel sum accumulated over sublane-dense 8-channel chunks so
    # no (Cp, Pp) f32 product is ever live (bounds vreg pressure at large C).
    acc = jnp.zeros((1, pp), jnp.float32)
    for c0 in range(0, cp, chunk):
        a = act_ref[0, c0:c0 + chunk, :].astype(jnp.float32)  # (chunk, Pp)
        acc = acc + jnp.sum(w[c0:c0 + chunk, :] * a, axis=0, keepdims=True)

    cam = jnp.maximum(acc, 0.0)                               # relu, (1, Pp)
    cam_ref[0] = cam

    # Per-image min/max partials, masked to the real spatial positions when P
    # was padded up to a lane multiple; combined across images in the wrapper.
    if p_valid < pp:
        lane = jax.lax.broadcasted_iota(jnp.int32, (1, pp), 1)
        valid = lane < p_valid
        mn_ref[0] = jnp.min(jnp.where(valid, cam, jnp.inf), axis=1, keepdims=True)
        mx_ref[0] = jnp.max(jnp.where(valid, cam, -jnp.inf), axis=1, keepdims=True)
    else:
        mn_ref[0] = jnp.min(cam, axis=1, keepdims=True)
        mx_ref[0] = jnp.max(cam, axis=1, keepdims=True)


def _normalize_kernel(params_ref, cam_ref, out_ref):
    """out = (cam - mn) * scale, with scalar mn/scale read from SMEM."""
    mn = params_ref[0]
    scale = params_ref[1]
    out_ref[...] = ((cam_ref[...] - mn) * scale).astype(out_ref.dtype)


class GetCAMPallas:
    """JAX/Pallas equivalent of GetCAM(channels)."""

    def __init__(self, channels):
        self.channels = channels

    def __call__(self, all_scores, activations):
        N, C, H, W = activations.shape
        assert C == self.channels
        P = H * W
        Pp = _round_up(P, _LANE)      # lane-dense loads/stores (review item 6)
        Cp = _round_up(C, _SUBLANE)   # sublane-dense channel chunks (review item 4)

        # ---- wrapper-side layout prep (HBM-side pads / free reshapes) -------
        scores = all_scores.reshape(N, C).astype(jnp.float32)
        if Cp != C:
            scores = jnp.pad(scores, ((0, 0), (0, Cp - C)),
                             constant_values=_NEG_BIG)
        scores_p = scores[:, :, None]                          # (N, Cp, 1)

        act = activations.reshape(N, C, P)
        if Cp != C or Pp != P:
            act = jnp.pad(act, ((0, 0), (0, Cp - C), (0, Pp - P)))
        # act: (N, Cp, Pp)

        # ---- pass 1: per-image cam (relu'd) + per-image min/max partials ----
        cam_relu, mn_part, mx_part = pl.pallas_call(
            functools.partial(_cam_kernel, p_valid=P, chunk=_SUBLANE),
            out_shape=(
                jax.ShapeDtypeStruct((N, 1, Pp), jnp.float32),
                jax.ShapeDtypeStruct((N, 1, 1), jnp.float32),
                jax.ShapeDtypeStruct((N, 1, 1), jnp.float32),
            ),
            grid=(N,),
            in_specs=[
                pl.BlockSpec((1, Cp, 1), lambda i: (i, 0, 0)),
                pl.BlockSpec((1, Cp, Pp), lambda i: (i, 0, 0)),
            ],
            out_specs=(
                pl.BlockSpec((1, 1, Pp), lambda i: (i, 0, 0)),
                pl.BlockSpec((1, 1, 1), lambda i: (i, 0, 0)),
                pl.BlockSpec((1, 1, 1), lambda i: (i, 0, 0)),
            ),
            compiler_params=pltpu.CompilerParams(
                dimension_semantics=("parallel",)),
        )(scores_p, act)
        # TODO(synk): if C*Pp per-image blocks ever approach the VMEM limit,
        # add a second ("arbitrary") grid axis over C with a VMEM accumulator.

        # ---- tiny cross-image reduction + exact scalar scale (plain XLA) ----
        mn = jnp.min(mn_part)
        mx = jnp.max(mx_part)
        # max(cam - mn) == mx - mn, so one exact scalar reciprocal replaces the
        # per-element divide pass.  mx == mn -> Inf/NaN, same as the torch code.
        scale = 1.0 / (mx - mn)
        params = jnp.stack([mn, scale]).astype(jnp.float32)    # (2,) -> SMEM

        # ---- pass 2: normalize (lane-dense scalar subtract + multiply) ------
        cam_n = pl.pallas_call(
            _normalize_kernel,
            out_shape=jax.ShapeDtypeStruct((N, 1, Pp), activations.dtype),
            grid=(N,),
            in_specs=[
                pl.BlockSpec(memory_space=pltpu.MemorySpace.SMEM),
                pl.BlockSpec((1, 1, Pp), lambda i: (i, 0, 0)),
            ],
            out_specs=pl.BlockSpec((1, 1, Pp), lambda i: (i, 0, 0)),
            compiler_params=pltpu.CompilerParams(
                dimension_semantics=("parallel",)),
        )(params, cam_relu)

        cam = cam_n[:, 0, :P].reshape(N, H, W)
        # torch .squeeze(): drops all size-1 dims (no-op for N > 1).
        return jnp.squeeze(cam)


if __name__ == "__main__":
    N, C, H, W = 2, 4, 16, 16

    key = jax.random.PRNGKey(0)
    ks, ka = jax.random.split(key, 2)
    all_scores = jax.random.normal(ks, (N, C), jnp.float32)
    activations = jax.random.normal(ka, (N, C, H, W), jnp.float32)

    model = GetCAMPallas(C)
    cam = model(all_scores, activations)
    cam = jax.block_until_ready(cam)

    # Pure-JAX reference mirroring the torch module line by line.
    weights = jax.nn.softmax(all_scores, axis=1)
    ref = (weights.reshape(-1, C, 1, 1) * activations).sum(axis=1)
    ref = jnp.squeeze(ref)
    ref = jnp.maximum(ref, 0.0)
    ref = ref - ref.min()
    ref = ref / ref.max()

    assert cam.shape == ref.shape == (N, H, W), (cam.shape, ref.shape)
    assert jnp.allclose(cam, ref, atol=1e-5, rtol=1e-5), float(jnp.max(jnp.abs(cam - ref)))
    print("KERNEL_OK")
</pallas_src>

<mosaic_0001>
module attributes {stable_mosaic.version = 11 : i64} {
  func.func @_cam_kernel(%arg0: i32, %arg1: memref<1x8x1xf32, #tpu.memory_space<vmem>>, %arg2: memref<1x8x256xf32, #tpu.memory_space<vmem>>, %arg3: memref<1x1x256xf32, #tpu.memory_space<vmem>>, %arg4: memref<1x1x1xf32, #tpu.memory_space<vmem>>, %arg5: memref<1x1x1xf32, #tpu.memory_space<vmem>>) attributes {dimension_semantics = [#tpu.dimension_semantics<parallel>], iteration_bounds = array<i64: 2>, scalar_prefetch = 0 : i64, scratch_operands = 0 : i64, tpu.core_type = #tpu.core_type<tc>, window_params = [{transform_indices = @transform_0, window_bounds = array<i64: 1, 8, 1>}, {transform_indices = @transform_1, window_bounds = array<i64: 1, 8, 256>}, {transform_indices = @transform_2, window_bounds = array<i64: 1, 1, 256>}, {transform_indices = @transform_3, window_bounds = array<i64: 1, 1, 1>}, {transform_indices = @transform_4, window_bounds = array<i64: 1, 1, 1>}]} {
    %c0 = arith.constant 0 : index
    %c0_0 = arith.constant 0 : index
    %c0_1 = arith.constant 0 : index
    %0 = vector.load %arg1[%c0, %c0_0, %c0_1] : memref<1x8x1xf32, #tpu.memory_space<vmem>>, vector<1x8x1xf32>
    %1 = vector.shape_cast %0 : vector<1x8x1xf32> to vector<8x1xf32>
    %cst = arith.constant dense<0xFF800000> : vector<1xf32>
    %2 = vector.multi_reduction <maximumf>, %1, %cst [0] : vector<8x1xf32> to vector<1xf32>
    %3 = vector.shape_cast %2 : vector<1xf32> to vector<1x1xf32>
    %4 = vector.broadcast %3 : vector<1x1xf32> to vector<8x1xf32>
    %5 = arith.subf %1, %4 : vector<8x1xf32>
    %6 = math.exp %5 : vector<8x1xf32>
    %cst_2 = arith.constant dense<0.000000e+00> : vector<1xf32>
    %7 = vector.multi_reduction <add>, %6, %cst_2 [0] : vector<8x1xf32> to vector<1xf32>
    %8 = vector.shape_cast %7 : vector<1xf32> to vector<1x1xf32>
    %9 = vector.broadcast %8 : vector<1x1xf32> to vector<8x1xf32>
    %10 = arith.divf %6, %9 : vector<8x1xf32>
    %cst_3 = arith.constant 0.000000e+00 : f32
    %11 = vector.broadcast %cst_3 : f32 to vector<1x256xf32>
    %c0_4 = arith.constant 0 : index
    %c0_5 = arith.constant 0 : index
    %c0_6 = arith.constant 0 : index
    %12 = vector.load %arg2[%c0_4, %c0_5, %c0_6] : memref<1x8x256xf32, #tpu.memory_space<vmem>>, vector<1x8x256xf32>
    %13 = vector.shape_cast %12 : vector<1x8x256xf32> to vector<8x256xf32>
    %14 = vector.broadcast %10 : vector<8x1xf32> to vector<8x256xf32>
    %15 = arith.mulf %14, %13 : vector<8x256xf32>
    %cst_7 = arith.constant dense<0.000000e+00> : vector<256xf32>
    %16 = vector.multi_reduction <add>, %15, %cst_7 [0] : vector<8x256xf32> to vector<256xf32>
    %17 = vector.shape_cast %16 : vector<256xf32> to vector<1x256xf32>
    %18 = arith.addf %11, %17 : vector<1x256xf32>
    %cst_8 = arith.constant 0.000000e+00 : f32
    %19 = vector.broadcast %cst_8 : f32 to vector<1x256xf32>
    %20 = arith.maximumf %18, %19 : vector<1x256xf32>
    %c0_9 = arith.constant 0 : index
    %c0_10 = arith.constant 0 : index
    %c0_11 = arith.constant 0 : index
    %21 = vector.load %arg3[%c0_9, %c0_10, %c0_11] : memref<1x1x256xf32, #tpu.memory_space<vmem>>, vector<1x1x256xf32>
    %22 = vector.shape_cast %21 : vector<1x1x256xf32> to vector<1x256xf32>
    %23 = vector.shape_cast %20 : vector<1x256xf32> to vector<1x1x256xf32>
    tpu.vector_store %arg3[%c0_9, %c0_10, %c0_11], %23 {strides = array<i32>} : memref<1x1x256xf32, #tpu.memory_space<vmem>>, vector<1x1x256xf32>,
    %cst_12 = arith.constant dense<0x7F800000> : vector<1xf32>
    %24 = vector.multi_reduction <minimumf>, %20, %cst_12 [1] : vector<1x256xf32> to vector<1xf32>
    %25 = vector.shape_cast %24 : vector<1xf32> to vector<1x1xf32>
    %c0_13 = arith.constant 0 : index
    %c0_14 = arith.constant 0 : index
    %c0_15 = arith.constant 0 : index
    %26 = vector.load %arg4[%c0_13, %c0_14, %c0_15] : memref<1x1x1xf32, #tpu.memory_space<vmem>>, vector<1x1x1xf32>
    %27 = vector.shape_cast %26 : vector<1x1x1xf32> to vector<1x1xf32>
    %28 = vector.shape_cast %25 : vector<1x1xf32> to vector<1x1x1xf32>
    tpu.vector_store %arg4[%c0_13, %c0_14, %c0_15], %28 {strides = array<i32>} : memref<1x1x1xf32, #tpu.memory_space<vmem>>, vector<1x1x1xf32>,
    %cst_16 = arith.constant dense<0xFF800000> : vector<1xf32>
    %29 = vector.multi_reduction <maximumf>, %20, %cst_16 [1] : vector<1x256xf32> to vector<1xf32>
    %30 = vector.shape_cast %29 : vector<1xf32> to vector<1x1xf32>
    %c0_17 = arith.constant 0 : index
    %c0_18 = arith.constant 0 : index
    %c0_19 = arith.constant 0 : index
    %31 = vector.load %arg5[%c0_17, %c0_18, %c0_19] : memref<1x1x1xf32, #tpu.memory_space<vmem>>, vector<1x1x1xf32>
    %32 = vector.shape_cast %31 : vector<1x1x1xf32> to vector<1x1xf32>
    %33 = vector.shape_cast %30 : vector<1x1xf32> to vector<1x1x1xf32>
    tpu.vector_store %arg5[%c0_17, %c0_18, %c0_19], %33 {strides = array<i32>} : memref<1x1x1xf32, #tpu.memory_space<vmem>>, vector<1x1x1xf32>,
    return
  }
  func.func @transform_0(%arg0: i32) -> (i32, i32, i32) {
    %c0_i32 = arith.constant 0 : i32
    %c0_i32_0 = arith.constant 0 : i32
    %c0_i32_1 = arith.constant 0 : i32
    return %arg0, %c0_i32, %c0_i32_0 : i32, i32, i32
  }
  func.func @transform_1(%arg0: i32) -> (i32, i32, i32) {
    %c0_i32 = arith.constant 0 : i32
    %c0_i32_0 = arith.constant 0 : i32
    %c0_i32_1 = arith.constant 0 : i32
    return %arg0, %c0_i32, %c0_i32_0 : i32, i32, i32
  }
  func.func @transform_2(%arg0: i32) -> (i32, i32, i32) {
    %c0_i32 = arith.constant 0 : i32
    %c0_i32_0 = arith.constant 0 : i32
    %c0_i32_1 = arith.constant 0 : i32
    return %arg0, %c0_i32, %c0_i32_0 : i32, i32, i32
  }
  func.func @transform_3(%arg0: i32) -> (i32, i32, i32) {
    %c0_i32 = arith.constant 0 : i32
    %c0_i32_0 = arith.constant 0 : i32
    %c0_i32_1 = arith.constant 0 : i32
    return %arg0, %c0_i32, %c0_i32_0 : i32, i32, i32
  }
  func.func @transform_4(%arg0: i32) -> (i32, i32, i32) {
    %c0_i32 = arith.constant 0 : i32
    %c0_i32_0 = arith.constant 0 : i32
    %c0_i32_1 = arith.constant 0 : i32
    return %arg0, %c0_i32, %c0_i32_0 : i32, i32, i32
  }
}

</mosaic_0001>

<bundles_post_ra>
// kernel: tpu_custom_call.1
= control target key start
LH: loop header
LB: loop body
LE: loop exit
PB: predicated region body
PF: predicated region fallthrough
CT: control target
= control target key end

     0   :  { %10 = vsyncpa [#allocation3], 0  ;;  %s846_s0 = inlined_call_operand.vmem [shape: f32[2,8,1], index: 0, kind: input, shape index: {}]   ;;  %s847_s1 = inlined_call_operand.hbm [shape: f32[2,8,256], index: 1, kind: input, shape index: {}]   ;;  %s848_s2 = inlined_call_operand.hbm [shape: f32[2,1,256], index: 2, kind: output, shape index: {0}]   ;;  %s849_s3 = inlined_call_operand.vmem [shape: f32[2,1,1], index: 3, kind: output, shape index: {1}]   ;;  %s850_s4 = inlined_call_operand.vmem [shape: f32[2,1,1], index: 4, kind: output, shape index: {2}]  }
   0x1   :  { %12 = vsyncpa [#allocation3 + $0x1], 0 }
   0x2   :  { %13 = vsyncpa [#allocation4], 0 }
   0x3   :  { %15 = vsyncpa [#allocation4 + $0x1], 0  ;;  %s670_s15 = smov 0   ;;  %s672_s16 = smov 0  }
   0x4   :  { %s674_s17 = smov 0   ;;  %s676_s18 = smov 0  }
   0x5 LB: > { %s691_s19 = sadd.s32 4294967295, %s639_s18   ;;  %s473_s20 = sadd.s32 4294967294, %s639_s18   ;;  %s639_s18 = sphi %s676_s18, %s865_s18   ;;  %s635_s17 = sphi %s674_s17, %s864_s17   ;;  %s631_s16 = sphi %s672_s16, %s863_s16   ;;  %s627_s15 = sphi %s670_s15, %s862_s15  }
   0x6   : > { %s695_s21 = sadd.s32 1, %s639_s18   ;;  %s54_s22 = sadd.s32 1, %s635_s17 }
   0x7   : > { %s51_s23 = ssub.s32 %s639_s18, %s695_s21  ;;  %p61_p0 = scmp.ne.s32.totalorder %s635_s17, %s631_s16 }
   0x8   : > { %p52_p1 = scmp.eq.s32.totalorder %s51_s23, 0  ;;  %p62_p2 = scmp.eq.s32.totalorder %s639_s18, 0 }
   0x9   : > { %p67_p3 = scmp.ne.s32.totalorder %s631_s16, %s627_s15  ;;  %p68_p4 = scmp.eq.s32.totalorder %s691_s19, 0 }
   0xa   : > { %s707_s24 = scalar_select %p52_p1, %s635_s17, %s54_s22  }
   0xb   : > { %p709_p5 = por %p62_p2, %p61_p0  ;;  %p713_p6 = por %p68_p4, %p67_p3 }
   0xc   : > { %p91_p7 = scmp.eq.s32.totalorder %s691_s19, 1  ;;  %p97_p8 = scmp.eq.s32.totalorder %s473_s20, 1 }
   0xd   : > { %p502_p10 = scmp.lt.s32.totalorder %s639_s18, 2  ;;  %s176_s29 = sand.u32 1, %s635_s17  }
   0xe   : > { %p720_p11 = por %p91_p7, %p61_p0  ;;  %p724_p12 = por %p97_p8, %p67_p3 }
   0xf   : > { %s488_s30 = sshll.u32 %s639_s18, 8  ;;  %s476_s5 = sshll.u32 %s176_s29, 4 }
  0x10   : > { %s854_s27 = scalar_select %p720_p11, 1, 0 }
  0x11   : > { %s855_s28 = scalar_select %p724_p12, 1, 0 }
  0x12   : > { %s733_s8 = scalar_lea.hbm %s847_s1, %s488_s30  ;;  %s180_s9 = scalar_lea.vmem [#allocation2], %s476_s5 }
  0x13   : > { %s188_s10 = sshll.u32 %s180_s9, 4  ;;  %p737_p13 = pnand %p502_p10, %p709_p5  ;;  %s741_s10 = int_to_ptr.vmem [resolvable:$true] %s188_s10 }
  0x14   : > { %s177_s12 = scalar_lea.sflag [#allocation3], %s176_s29  ;;  %s543_s13 = scalar_lea.hbm %s733_s8, 256 }
  0x15   : > { %p544_p2 = scmp.ne.s32.totalorder %s733_s8, %s543_s13  ;;  %p545_p3 = pneg %p737_p13 }
  0x16   : > { %s548_s22 = scalar_lea.hbm %s847_s1, 512  ;;  %p549_p5 = scmp.lt.u32.totalorder %s733_s8, %s847_s1 }
  0x17   : > { %p546_p4 = pnand %p545_p3, %p544_p2  ;;  %p550_p8 = scmp.lt.u32.totalorder %s548_s22, %s543_s13 }
  0x18   : > { %p552_p9 = scmp.lt.u32.totalorder %s543_s13, %s733_s8 }
  0x19   : > { %p547_p7 = pneg %p546_p4  ;;  %p551_p10 = por %p550_p8, %p549_p5 }
  0x1b   : > { %p553_p0 = por %p552_p9, %p551_p10 }
  0x1d   : > { %p554_p1 = pnand %p553_p0, %p547_p7 }
  0x1f   : > { %557 = shalt.err (!%p554_p1)
}
  0x20   : > { %s558_s29 = scalar_lea.vmem %s741_s10, 256  ;;  %s641_s30 = smov [#allocation2]  }
  0x21   : > { %p559_p2 = scmp.ne.s32.totalorder %s741_s10, %s558_s29  ;;  %s563_s5 = sshll.u32 %s641_s30, 4  ;;  %s564_s5 = int_to_ptr.vmem [resolvable:$false] %s563_s5 }
  0x22   : > { %s565_s6 = scalar_lea.vmem %s564_s5, 512  ;;  %p566_p11 = scmp.lt.s32.totalorder %s741_s10, %s564_s5 }
  0x23   : > { %p561_p4 = pnand %p559_p2, %p545_p3  ;;  %p567_p5 = scmp.lt.s32.totalorder %s565_s6, %s558_s29 }
  0x25   : > { %p562_p12 = pneg %p561_p4  ;;  %p568_p8 = por %p567_p5, %p566_p11 }
  0x27   : > { %p569_p9 = pnand %p568_p8, %p562_p12 }
  0x29   : > { %572 = shalt.err (!%p569_p9)
}
  0x2a   : > { %497 = dma.hbm_to_vmem [thread:$0]  (!%p737_p13), %s733_s8, 256, %s741_s10, %s177_s12  }
  0x2b   : > { %p857_p0 = scmp.lt.s32.totalorder %s639_s18, 3  ;;  %p858_p1 = scmp.ge.s32.totalorder %s639_s18, 1 }
  0x2d   : > { %p194_p3 = pnand %p858_p1, %p857_p0 }
  0x2e   : > { %s775_s7 = sand.u32 (!%p194_p3), 1, %s631_s16  }
  0x2f   : > { %197 = sbr.rel (%p194_p3) target bundleno = 405 (0x195), region = 28  ;;  %s480_s9 = sshll.u32 (!%p194_p3), %s775_s7, 4 }
  0x30   : > { %s200_s13 = scalar_lea.sflag (!%p194_p3), [#allocation3], %s775_s7  ;;  %s779_s14 = scalar_lea.vmem (!%p194_p3), [#allocation2], %s480_s9 }
  0x36   : > { %618 = dma.done.wait (%p713_p6), %s200_s13, 256  }
  0x37   : > { %620 = vsyncadd (%p713_p6), %s200_s13, 4294967040  ;;  %p238_p11 = scmp.lt.s32.totalorder %s691_s19, 1  ;;  %v642_v0 = vmov 0   ;;  %vm249_vm0 = vcmask 7168   ;;  %v269_v21 = vld [vmem:[%s779_s14] sm:$0xff]  ;;  %v270_v22 = vld [vmem:[%s779_s14 + $0x8] sm:$0xff]  ;;  %v300_v34 = vlaneseq }
  0x38   : > { %538 = vset.pattern.permute.xlu0 %v642_v0  ;;  %v643_v32 = vmov 1966171168   ;;  %s481_s26 = sshll.u32 %s775_s7, 1  ;;  %s489_s23 = sshll.u32 %s691_s19, 5 }
  0x39   : > { %s787_s8 = scalar_select %p238_p11, %s691_s19, 1  ;;  %v298_v33 = vunpack.c.l.s4 %v643_v32  ;;  %v301_v40 = vshrl.u32 %v300_v34, 7  ;;  %vm314_vm1 = vcmp.lt.s32.totalorder %v300_v34, 256 }
  0x3a   : > { %s227_s22 = scalar_lea.vmem [#allocation5], %s481_s26  ;;  %s800_s5 = scalar_lea.hbm %s848_s2, %s489_s23 }
  0x3b   : > { %s482_s10 = sshll.u32 %s787_s8, 3  ;;  %v299_v39 = vunpack.c.0.s8 %v298_v33  ;;  %s347_s25 = sshll.u32 %s227_s22, 4  ;;  %s348_s25 = int_to_ptr.vmem [resolvable:$true] %s347_s25 }
  0x3c   : > { %s241_s20 = scalar_lea.vmem %s846_s0, %s482_s10  ;;  %s327_s6 = scalar_lea.sflag [#allocation4], %s775_s7 }
  0x3d   : > { %v248_v1 = vld [vmem:[%s241_s20] sm:$0xff]  ;;  %v302_v45 = vsub.s32 %v299_v39, %v301_v40  ;;  %s573_s9 = scalar_lea.vmem %s348_s25, 32  ;;  %p859_p12 = scmp.ne.s32.totalorder %s854_s27, 0 }
  0x3e   : > { %v250_v2 = vsel %vm249_vm0, %v248_v1, -inf  ;;  %p574_p6 = scmp.ne.s32.totalorder %s348_s25, %s573_s9  ;;  %s644_s13 = smov [#allocation5]  }
  0x3f   : > { %v251_v3 = vrot.slane %v250_v2, 4  ;;  %s577_s14 = sshll.u32 %s644_s13, 4  ;;  %s578_s14 = int_to_ptr.vmem [resolvable:$false] %s577_s14 }
  0x40   : > { %p575_p13 = pnand %p574_p6, %p859_p12  ;;  %s579_s10 = scalar_lea.vmem %s578_s14, 64 }
  0x41   : > { %v252_v4 = vmax.f32 %v250_v2, %v251_v3  ;;  %p580_p10 = scmp.lt.s32.totalorder %s348_s25, %s578_s14  ;;  %p581_p2 = scmp.lt.s32.totalorder %s579_s10, %s573_s9 }
  0x42   : > { %p576_p7 = pneg %p575_p13 }
  0x43   : > { %v253_v5 = vrot.slane %v252_v4, 2  ;;  %p582_p4 = por %p581_p2, %p580_p10 }
  0x45   : > { %v254_v6 = vmax.f32 %v252_v4, %v253_v5  ;;  %p583_p5 = pnand %p582_p4, %p576_p7 }
  0x47   : > { %v255_v7 = vrot.slane %v254_v6, 1 }
  0x49   : > { %v256_v8 = vmax.f32 %v254_v6, %v255_v7 }
  0x4b   : > { %v257_v9 = vsub.f32 %v248_v1, %v256_v8 }
  0x4d   : > { %v258_v10 = vmul.f32 1.442695, %v257_v9 }
  0x4f   : > { %539 = vpow2.f32 %v258_v10 }
  0x59   : > { %v540_v11 = vpop.eup %539 }
  0x5a   : > { %v260_v12 = vsel %vm249_vm0, %v540_v11, 0.0 }
  0x5b   : > { %v261_v13 = vrot.slane %v260_v12, 4 }
  0x5d   : > { %v262_v14 = vadd.f32 %v261_v13, %v260_v12 }
  0x5f   : > { %v263_v15 = vrot.slane %v262_v14, 2 }
  0x61   : > { %v264_v16 = vadd.f32 %v263_v15, %v262_v14 }
  0x63   : > { %v265_v17 = vrot.slane %v264_v16, 1 }
  0x65   : > { %v266_v18 = vadd.f32 %v265_v17, %v264_v16 }
  0x67   : > { %541 = vrcp.f32 %v266_v18 }
  0x71   : > { %v542_v19 = vpop.eup %541 }
  0x72   : > { %v268_v20 = vmul.f32 %v542_v19, %v540_v11 }
  0x74   : > { %273 = vperm.xlu0 %538, %v268_v20  }
  0xf3   : > { %v274_v23 = vpop.permute.xlu0 %273 }
  0xf4   : > { %v276_v24 = vmul.f32 %v274_v23, %v269_v21  ;;  %v277_v25 = vmul.f32 %v274_v23, %v270_v22 }
  0xf6   : > { %v278_v26 = vrot.slane %v276_v24, 4  ;;  %v284_v27 = vrot.slane %v277_v25, 4 }
  0xf8   : > { %v279_v28 = vadd.f32 %v278_v26, %v276_v24  ;;  %v285_v29 = vadd.f32 %v284_v27, %v277_v25 }
  0xfa   : > { %v280_v30 = vrot.slane %v279_v28, 2  ;;  %v286_v31 = vrot.slane %v285_v29, 2 }
  0xfc   : > { %v281_v35 = vadd.f32 %v280_v30, %v279_v28  ;;  %v287_v36 = vadd.f32 %v286_v31, %v285_v29 }
  0xfe   : > { %v282_v37 = vrot.slane %v281_v35, 1  ;;  %v288_v38 = vrot.slane %v287_v36, 1 }
 0x100   : > { %v283_v41 = vadd.f32 %v282_v37, %v281_v35  ;;  %v289_v42 = vadd.f32 %v288_v38, %v287_v36 }
 0x102   : > { %v292_v43 = vmax.f32 %v283_v41, 0.0  ;;  %v293_v44 = vmax.f32 %v289_v42, 0.0 }
 0x104   : > { %v322_v46 = vmax.f32 %v292_v43, %v293_v44  ;;  %v296_v47 = vcombine.low %v292_v43, %v293_v44  ;;  %v317_v48 = vmin.f32 %v292_v43, %v293_v44 }
 0x106   : > { %323 = vmax.xlane.f32.xlu1 %v322_v46  ;;  %v303_v49 = vrot.slane %v296_v47, %v302_v45  ;;  %318 = vmin.xlane.f32.xlu0 %v317_v48 }
 0x108   : > { %v310_v50 = vrot.slane %v303_v49, %v302_v45 }
 0x10a   : > { %316 = vst.msk [vmem:[%s227_s22] sm:$0x3] %vm314_vm1, %v310_v50 }
 0x10b   : > { %586 = shalt.err (!%p583_p5)
}
 0x10c   : > { %s587_s19 = scalar_lea.hbm %s800_s5, 32  ;;  %s591_s12 = scalar_lea.hbm %s848_s2, 64 }
 0x10d   : > { %p588_p8 = scmp.ne.s32.totalorder %s800_s5, %s587_s19  ;;  %p592_p1 = scmp.lt.u32.totalorder %s800_s5, %s848_s2 }
 0x10e   : > { %p593_p3 = scmp.lt.u32.totalorder %s591_s12, %s587_s19  ;;  %p595_p6 = scmp.lt.u32.totalorder %s587_s19, %s800_s5 }
 0x10f   : > { %p589_p9 = pnand %p588_p8, %p859_p12 }
 0x110   : > { %p594_p11 = por %p593_p3, %p592_p1 }
 0x111   : > { %p590_p0 = pneg %p589_p9 }
 0x112   : > { %p596_p13 = por %p595_p6, %p594_p11 }
 0x114   : > { %p597_p7 = pnand %p596_p13, %p590_p0 }
 0x116   : > { %600 = shalt.err (!%p597_p7)
}
 0x117   : > { %492 = dma.vmem_to_hbm [thread:$0]  (%p859_p12), %s348_s25, 32, %s800_s5, %s327_s6   ;;  %vm320_vm2 = vcmask 0  }
 0x118   : > { %s247_s29 = scalar_lea.vmem %s850_s4, %s787_s8  ;;  %s244_s13 = scalar_lea.vmem %s849_s3, %s787_s8 }
 0x193   : > { %v324_v51 = vpop.xlane.xlu1 %323  ;;  %v319_v52 = vpop.xlane.xlu0 %318 }
 0x194   : > { %325 = vst.msk [vmem:[%s247_s29] sm:$0x1] %vm320_vm2, %v324_v51  ;;  %321 = vst.msk [vmem:[%s244_s13] sm:$0x1] %vm320_vm2, %v319_v52 }
 0x195 PF: > { %s365_s27 = sand.u32 1, %s627_s15   ;;  %p860_p10 = scmp.ne.s32.totalorder %s855_s28, 0 }
 0x196   : > { %p861_p12 = scmp.ge.s32.totalorder %s639_s18, 2  ;;  %s366_s25 = scalar_lea.sflag [#allocation4], %s365_s27 }
 0x198   : > { %p499_p2 = pnand %p861_p12, %p860_p10 }
 0x19a   : > { %622 = dma.done.wait (!%p499_p2), %s366_s25, 32  }
 0x19b   : > { %624 = vsyncadd (!%p499_p2), %s366_s25, 4294967264  ;;  %p18_p4 = scmp.ge.s32.totalorder %s695_s21, 4   ;;  %s862_s15 = smov %s631_s16 }
 0x19c   : > { %s863_s16 = smov %s635_s17  ;;  %s864_s17 = smov %s707_s24 }
 0x19d   : > { %s865_s18 = smov %s695_s21  ;;  %20 = sbr.rel (!%p18_p4) target bundleno = 5 (0x5), region = 100 }
 0x1a4   :  { %383 = vsyncpa [#allocation3], 1 }
 0x1a5   :  { %385 = vsyncpa [#allocation3 + $0x1], 1 }
 0x1a6   :  { %386 = vsyncpa [#allocation4], 1 }
 0x1a7   :  { %388 = vsyncpa [#allocation4 + $0x1], 1 }

</bundles_post_ra>
